<compile_context>
chip_gen: v6e
topology: v6e:2x2x1
jax: 0.10.0
libtpu: 0.0.40
codegen_flags: <defaults>
</compile_context>

<pallas_src>
import functools
import math

import jax
import jax.numpy as jnp
from jax import lax
from jax.experimental import pallas as pl
from jax.experimental.pallas import tpu as pltpu


def _round_up(n: int, m: int) -> int:
    return ((n + m - 1) // m) * m


def _mlp_kernel(x_ref, w1t_ref, b1_ref, w2_ref, b2_ref, o_ref, *, hc, n_chunks):
    """One batch tile of: out = ReLU(x @ W1^T + b1) @ W2^T + b2  (out_features == 1).

    x_ref  : (tm, K)  bf16   streamed per grid step
    w1t_ref: (K, Hp)  bf16   resident (W1 transposed once in the wrapper)
    b1_ref : (1, Hp)  f32    resident
    w2_ref : (1, Hp)  f32    resident
    b2_ref : (1, 1)   f32    resident
    o_ref  : (tm, 1)  f32
    """
    x = x_ref[...]  # (tm, K) bf16

    def chunk(c, acc):
        off = pl.multiple_of(c * hc, hc)
        # Layer 1 on the MXU, f32 accumulation.
        h = jnp.dot(x, w1t_ref[:, pl.ds(off, hc)],
                    preferred_element_type=jnp.float32)           # (tm, hc) f32
        # Bias + ReLU on the VPU (f32 epilogue on every generation, incl. v5e).
        h = jnp.maximum(h + b1_ref[:, pl.ds(off, hc)], 0.0)
        # Layer 2 (N == 1): VPU multiply + XLU lane-reduce, accumulate partials.
        return acc + jnp.sum(h * w2_ref[:, pl.ds(off, hc)], axis=-1, keepdims=True)

    acc = jnp.zeros((x.shape[0], 1), jnp.float32)
    acc = lax.fori_loop(0, n_chunks, chunk, acc, unroll=True)
    o_ref[...] = acc + b2_ref[...]


def mlp_forward(x, w1, b1, w2, b2, *, tm=None, compute_dtype=jnp.bfloat16):
    """MLP forward.

    x : (B, input_size)
    w1: (hidden_size, input_size)  PyTorch Linear weight layout
    b1: (hidden_size,)
    w2: (1, hidden_size)
    b2: (1,)
    returns (B, 1) float32
    """
    x = jnp.asarray(x)
    w1 = jnp.asarray(w1, jnp.float32)
    b1 = jnp.asarray(b1, jnp.float32)
    w2 = jnp.asarray(w2, jnp.float32)
    b2 = jnp.asarray(b2, jnp.float32)

    B, K = x.shape
    H = w1.shape[0]

    # Hidden dim padded to full 128-lane vregs (weights only; padded b1/w2 rows
    # are zero, so they contribute exactly 0 through ReLU * 0). x is neither
    # copied, transposed nor padded.
    Hp = _round_up(H, 128)

    # Hidden-dim chunk width (multiple of 128/256 for dense MXU passes).
    hc = next(c for c in (512, 256, 128) if Hp % c == 0)
    n_chunks = Hp // hc

    # Batch tile: ~4 MiB of streamed x per grid step (amortizes ~0.35 us/step
    # overhead), capped so both v7x TensorCores get work, never padding tiny
    # batches.
    if tm is None:
        itemsize = jnp.dtype(compute_dtype).itemsize
        tm = (4 * 1024 * 1024) // max(K * itemsize, 1)
        tm = max(256, min(2048, (tm // 128) * 128))
        half = _round_up((B + 1) // 2, 128)
        if half >= 256:
            tm = min(tm, half)      # => at least 2 grid steps for big batches
        if B <= tm:
            tm = B                  # single exact block, no padded batch rows
    grid = (pl.cdiv(B, tm),)

    # One-time (tiny) weight plumbing: transpose W1, cast MXU operands to bf16.
    x_c = x.astype(compute_dtype)
    w1t = jnp.zeros((K, Hp), compute_dtype).at[:, :H].set(w1.T.astype(compute_dtype))
    b1p = jnp.zeros((1, Hp), jnp.float32).at[0, :H].set(b1)
    w2p = jnp.zeros((1, Hp), jnp.float32).at[0, :H].set(w2.reshape(-1))
    b2p = b2.reshape(1, 1)

    # Scoped-VMEM budget: ~75% of physical, so the config fits v7x's 64 MiB
    # while still exploiting v5e/v6e's 128 MiB.
    try:
        vmem_cap = int(pltpu.get_tpu_info().vmem_capacity_bytes)
    except Exception:
        vmem_cap = 64 * 1024 * 1024
    vmem_limit = max(32 * 1024 * 1024, min(vmem_cap * 3 // 4, 100 * 1024 * 1024))

    flops = 2 * B * K * Hp + 4 * B * Hp
    bytes_accessed = (B * K + K * Hp) * jnp.dtype(compute_dtype).itemsize + \
                     4 * (2 * Hp + 1 + B)

    kernel = functools.partial(_mlp_kernel, hc=hc, n_chunks=n_chunks)
    resident = dict(pipeline_mode=pl.Buffered(1))   # weights: no double buffer

    out = pl.pallas_call(
        kernel,
        out_shape=jax.ShapeDtypeStruct((B, 1), jnp.float32),
        grid_spec=pltpu.PrefetchScalarGridSpec(
            num_scalar_prefetch=0,
            grid=grid,
            in_specs=[
                # Streamed batch tiles of x in natural (B, K) layout.
                pl.BlockSpec((tm, K), lambda i: (i, 0)),
                # Resident weights / biases (constant block index -> DMA once,
                # single-buffered).
                pl.BlockSpec((K, Hp), lambda i: (0, 0), **resident),
                pl.BlockSpec((1, Hp), lambda i: (0, 0), **resident),
                pl.BlockSpec((1, Hp), lambda i: (0, 0), **resident),
                pl.BlockSpec((1, 1), lambda i: (0, 0), **resident),
            ],
            out_specs=pl.BlockSpec((tm, 1), lambda i: (i, 0)),
        ),
        compiler_params=pltpu.CompilerParams(
            dimension_semantics=("parallel",),
            vmem_limit_bytes=int(vmem_limit),
        ),
        cost_estimate=pl.CostEstimate(
            flops=int(flops), transcendentals=0, bytes_accessed=int(bytes_accessed)
        ),
    )(x_c, w1t, b1p, w2p, b2p)

    return out


def init_params(key, input_size, hidden_size):
    """Deterministic init mirroring the PyTorch module's init scheme.

    Returns PyTorch-layout params: w1 (H, in), b1 (H,), w2 (1, H), b2 (1,)
    """
    k1, k2, k3, k4 = jax.random.split(key, 4)

    # hidden.weight: kaiming_uniform_(nonlinearity='relu')
    bound_w1 = math.sqrt(2.0) * math.sqrt(3.0 / input_size)
    w1 = jax.random.uniform(
        k1, (hidden_size, input_size), jnp.float32, -bound_w1, bound_w1
    )
    # hidden.bias: default uniform(-1/sqrt(fan_in), 1/sqrt(fan_in))
    bound_b1 = 1.0 / math.sqrt(input_size)
    b1 = jax.random.uniform(k2, (hidden_size,), jnp.float32, -bound_b1, bound_b1)
    # output.weight: xavier_uniform_
    bound_w2 = math.sqrt(6.0 / (hidden_size + 1))
    w2 = jax.random.uniform(k3, (1, hidden_size), jnp.float32, -bound_w2, bound_w2)
    # output.bias: default uniform(-1/sqrt(fan_in), 1/sqrt(fan_in))
    bound_b2 = 1.0 / math.sqrt(hidden_size)
    b2 = jax.random.uniform(k4, (1,), jnp.float32, -bound_b2, bound_b2)

    return w1, b1, w2, b2


if __name__ == "__main__":
    key = jax.random.PRNGKey(0)
    batch, input_size, hidden_size = 8, 16, 32

    kx, kp = jax.random.split(key)
    x = jax.random.normal(kx, (batch, input_size), jnp.float32)
    w1, b1, w2, b2 = init_params(kp, input_size, hidden_size)

    out = mlp_forward(x, w1, b1, w2, b2)
    jax.block_until_ready(out)

    # Pure-JAX reference. The kernel's MXU operands are bf16 (f32 accumulation),
    # so compare against the same bf16-rounded operands.
    xr = x.astype(jnp.bfloat16).astype(jnp.float32)
    w1r = w1.astype(jnp.bfloat16).astype(jnp.float32)
    ref = jnp.maximum(xr @ w1r.T + b1, 0.0) @ w2.T + b2

    assert out.shape == (batch, 1)
    assert jnp.allclose(out, ref, atol=3e-2, rtol=3e-2), (
        jnp.max(jnp.abs(out - ref))
    )

    print("KERNEL_OK")
</pallas_src>

<mosaic_0001>
module attributes {stable_mosaic.version = 11 : i64} {
  func.func @_mlp_kernel(%arg0: i32, %arg1: memref<8x16xbf16, #tpu.memory_space<vmem>>, %arg2: memref<16x128xbf16, #tpu.memory_space<vmem>>, %arg3: memref<1x128xf32, #tpu.memory_space<vmem>>, %arg4: memref<1x128xf32, #tpu.memory_space<vmem>>, %arg5: memref<1x1xf32, #tpu.memory_space<vmem>>, %arg6: memref<8x1xf32, #tpu.memory_space<vmem>>) attributes {dimension_semantics = [#tpu.dimension_semantics<parallel>], iteration_bounds = array<i64: 1>, scalar_prefetch = 0 : i64, scratch_operands = 0 : i64, tpu.core_type = #tpu.core_type<tc>, window_params = [{transform_indices = @transform_0, window_bounds = array<i64: 8, 16>}, {pipeline_mode = #tpu.pipeline_mode<synchronous>, transform_indices = @transform_1, window_bounds = array<i64: 16, 128>}, {pipeline_mode = #tpu.pipeline_mode<synchronous>, transform_indices = @transform_2, window_bounds = array<i64: 1, 128>}, {pipeline_mode = #tpu.pipeline_mode<synchronous>, transform_indices = @transform_3, window_bounds = array<i64: 1, 128>}, {pipeline_mode = #tpu.pipeline_mode<synchronous>, transform_indices = @transform_4, window_bounds = array<i64: 1, 1>}, {transform_indices = @transform_5, window_bounds = array<i64: 8, 1>}]} {
    %c0 = arith.constant 0 : index
    %c0_0 = arith.constant 0 : index
    %0 = vector.load %arg1[%c0, %c0_0] : memref<8x16xbf16, #tpu.memory_space<vmem>>, vector<8x16xbf16>
    %cst = arith.constant 0.000000e+00 : f32
    %1 = vector.broadcast %cst : f32 to vector<8x1xf32>
    %c0_i32 = arith.constant 0 : i32
    %c128_i32 = arith.constant 128 : i32
    %2 = arith.muli %c0_i32, %c128_i32 : i32
    %3 = tpu.assume_multiple %2, 128 : i32
    %c0_1 = arith.constant 0 : index
    %4 = arith.index_cast %3 : i32 to index
    %5 = vector.load %arg2[%c0_1, %4] : memref<16x128xbf16, #tpu.memory_space<vmem>>, vector<16x128xbf16>
    %cst_2 = arith.constant dense<0.000000e+00> : vector<8x128xf32>
    %6 = tpu.matmul %0, %5, %cst_2 {dimension_numbers = #tpu.dot_dimension_numbers<[1], [0], [0], [1], [0, 0, 1, 1], [], []>} : vector<8x16xbf16>, vector<16x128xbf16>, vector<8x128xf32> -> vector<8x128xf32>
    %c0_3 = arith.constant 0 : index
    %7 = arith.index_cast %3 : i32 to index
    %8 = vector.load %arg3[%c0_3, %7] : memref<1x128xf32, #tpu.memory_space<vmem>>, vector<1x128xf32>
    %9 = vector.broadcast %8 : vector<1x128xf32> to vector<8x128xf32>
    %10 = arith.addf %6, %9 : vector<8x128xf32>
    %cst_4 = arith.constant 0.000000e+00 : f32
    %11 = vector.broadcast %cst_4 : f32 to vector<8x128xf32>
    %12 = arith.maximumf %10, %11 : vector<8x128xf32>
    %c0_5 = arith.constant 0 : index
    %13 = arith.index_cast %3 : i32 to index
    %14 = vector.load %arg4[%c0_5, %13] : memref<1x128xf32, #tpu.memory_space<vmem>>, vector<1x128xf32>
    %15 = vector.broadcast %14 : vector<1x128xf32> to vector<8x128xf32>
    %16 = arith.mulf %12, %15 : vector<8x128xf32>
    %cst_6 = arith.constant dense<0.000000e+00> : vector<8xf32>
    %17 = vector.multi_reduction <add>, %16, %cst_6 [1] : vector<8x128xf32> to vector<8xf32>
    %18 = vector.shape_cast %17 : vector<8xf32> to vector<8x1xf32>
    %19 = arith.addf %1, %18 : vector<8x1xf32>
    %c1_i32 = arith.constant 1 : i32
    %c0_7 = arith.constant 0 : index
    %c0_8 = arith.constant 0 : index
    %20 = vector.load %arg5[%c0_7, %c0_8] : memref<1x1xf32, #tpu.memory_space<vmem>>, vector<1x1xf32>
    %21 = vector.broadcast %20 : vector<1x1xf32> to vector<8x1xf32>
    %22 = arith.addf %19, %21 : vector<8x1xf32>
    %c0_9 = arith.constant 0 : index
    %c0_10 = arith.constant 0 : index
    %23 = vector.load %arg6[%c0_9, %c0_10] : memref<8x1xf32, #tpu.memory_space<vmem>>, vector<8x1xf32>
    tpu.vector_store %arg6[%c0_9, %c0_10], %22 {strides = array<i32>} : memref<8x1xf32, #tpu.memory_space<vmem>>, vector<8x1xf32>,
    return
  }
  func.func @transform_0(%arg0: i32) -> (i32, i32) {
    %c0_i32 = arith.constant 0 : i32
    %c0_i32_0 = arith.constant 0 : i32
    return %arg0, %c0_i32 : i32, i32
  }
  func.func @transform_1(%arg0: i32) -> (i32, i32) {
    %c0_i32 = arith.constant 0 : i32
    %c0_i32_0 = arith.constant 0 : i32
    %c0_i32_1 = arith.constant 0 : i32
    return %c0_i32, %c0_i32_0 : i32, i32
  }
  func.func @transform_2(%arg0: i32) -> (i32, i32) {
    %c0_i32 = arith.constant 0 : i32
    %c0_i32_0 = arith.constant 0 : i32
    %c0_i32_1 = arith.constant 0 : i32
    return %c0_i32, %c0_i32_0 : i32, i32
  }
  func.func @transform_3(%arg0: i32) -> (i32, i32) {
    %c0_i32 = arith.constant 0 : i32
    %c0_i32_0 = arith.constant 0 : i32
    %c0_i32_1 = arith.constant 0 : i32
    return %c0_i32, %c0_i32_0 : i32, i32
  }
  func.func @transform_4(%arg0: i32) -> (i32, i32) {
    %c0_i32 = arith.constant 0 : i32
    %c0_i32_0 = arith.constant 0 : i32
    %c0_i32_1 = arith.constant 0 : i32
    return %c0_i32, %c0_i32_0 : i32, i32
  }
  func.func @transform_5(%arg0: i32) -> (i32, i32) {
    %c0_i32 = arith.constant 0 : i32
    %c0_i32_0 = arith.constant 0 : i32
    return %arg0, %c0_i32 : i32, i32
  }
}

</mosaic_0001>

<bundles_post_ra>
// kernel: tpu_custom_call.1
= control target key start
LH: loop header
LB: loop body
LE: loop exit
PB: predicated region body
PF: predicated region fallthrough
CT: control target
= control target key end

     0   :  { %s255_s0 = inlined_call_operand.hbm [shape: bf16[8,16], index: 0, kind: input, shape index: {}]   ;;  %s256_s1 = inlined_call_operand.hbm [shape: bf16[16,128], index: 1, kind: input, shape index: {}]   ;;  %s257_s2 = inlined_call_operand.vmem [shape: f32[1,128], index: 2, kind: input, shape index: {}]   ;;  %s258_s3 = inlined_call_operand.vmem [shape: f32[1,128], index: 3, kind: input, shape index: {}]   ;;  %s259_s4 = inlined_call_operand.<no memory space> [shape: f32[1,1], index: 4, kind: input, shape index: {}]   ;;  %s260_s5 = inlined_call_operand.vmem [shape: f32[8,1], index: 5, kind: output, shape index: {}]  }
   0x1   :  { %v10_v0 = vstv %s259_s4 }
   0x2   :  { %11 = vst [vmem:[#allocation2] sm:$0x1] %v10_v0 }
   0x3   :  { %12 = vsyncpa [#allocation4], 0 }
   0x4   :  { %13 = vsyncpa [#allocation6], 0  ;;  %s201_s20 = smov [#allocation3]   ;;  %s202_s22 = smov [#allocation5]  }
   0x5   :  { %s20_s21 = sshll.u32 %s201_s20, 4  ;;  %s29_s23 = sshll.u32 %s202_s22, 4  ;;  %s21_s21 = int_to_ptr.vmem [resolvable:$true] %s20_s21  ;;  %s30_s23 = int_to_ptr.vmem [resolvable:$true] %s29_s23 }
   0x6   :  { %s165_s24 = scalar_lea.vmem %s21_s21, 64  ;;  %p170_p1 = scmp.lt.s32.totalorder %s21_s21, %s21_s21 }
   0x7   :  { %p166_p0 = scmp.ne.s32.totalorder %s21_s21, %s165_s24  ;;  %p171_p2 = scmp.lt.s32.totalorder %s165_s24, %s165_s24 }
   0x9   :  { %p172_p3 = por %p171_p2, %p170_p1 }
   0xb   :  { %p173_p4 = pnand %p172_p3, %p166_p0 }
   0xd   :  { %176 = shalt.err (!%p173_p4)
}
   0xe   :  { %23 = dma.hbm_to_vmem [thread:$0]  %s255_s0, 64, %s21_s21, [#allocation4]  }
   0xf   :  { %s185_s4 = scalar_lea.vmem %s30_s23, 128  ;;  %p190_p6 = scmp.lt.s32.totalorder %s30_s23, %s30_s23 }
  0x10   :  { %p186_p5 = scmp.ne.s32.totalorder %s30_s23, %s185_s4  ;;  %p191_p7 = scmp.lt.s32.totalorder %s185_s4, %s185_s4 }
  0x12   :  { %p192_p8 = por %p191_p7, %p190_p6 }
  0x14   :  { %p193_p9 = pnand %p192_p8, %p186_p5 }
  0x16   :  { %196 = shalt.err (!%p193_p9)
}
  0x17   :  { %s203_s27 = smov 64   ;;  %s204_s28 = smov 4  }
  0x18   :  { %35 = dma.hbm_to_vmem [thread:$0]  %s256_s1, 128, %s30_s23, [#allocation6], %s203_s27, %s203_s27, %s204_s28  }
  0x19   :  { %197 = dma.done.wait [#allocation4], 64  }
  0x1a   :  { %198 = vsyncadd [#allocation4], 4294967232 }
  0x1b   :  { %199 = dma.done.wait [#allocation6], 128  }
  0x1c   :  { %200 = vsyncadd [#allocation6], 4294967168  ;;  %v205_v1 = vmov 0.0   ;;  %vm206_vm0 = vmmov 0   ;;  %v156_v2 = vld [vmem:[#allocation5] sm:$0xff]   ;;  %vm65_vm1 = vcmask 130048  }
  0x1d   :  { %144 = vmatprep.subr.bf16.mxu0 %v205_v1  ;;  %146 = vmatprep.mubr.msk.bf16.mxu0 %vm206_vm0, %v205_v1  ;;  %v49_v3 = vld [vmem:[#allocation3] sm:$0xf]  ;;  %v137_v4 = vld [vmem:[%s257_s2] ss:$0 sm:$0xff]  ;;  %vm129_vm2 = vcmask 7168  }
  0x1e   :  { %145 = vmatpush3.bf16.msra.mxu0 %v156_v2  ;;  %v140_v8 = vld [vmem:[%s258_s3] ss:$0 sm:$0xff] }
  0x1f   :  { %v141_v13 = vld [vmem:[#allocation2] ss:$0 sm:$0xff] }
  0x21   :  { %147 = vmatmul.mubr.msk.bf16.vlgmr.msra.gmra.mxu0 %vm65_vm1, %v49_v3 }
  0xe1   :  { %v103_v5 = vpop.f32.mrf.mxu0 }
  0xe2   :  { %v104_v6 = vadd.f32 %v137_v4, %v103_v5 }
  0xe3   :  { %v148_v7 = vpop.f32.mrf.mxu0 }
  0xe4   :  { %v109_v9 = vmax.f32 %v104_v6, 0.0 }
  0xe5   :  { %v106_v10 = vpop.f32.mrf.mxu0 }
  0xe6   :  { %v117_v11 = vmul.f32 %v140_v8, %v109_v9 }
  0xe7   :  { %v149_v12 = vpop.f32.mrf.mxu0 }
  0xe8   :  { %118 = vadd.xlane.f32.xlu0 %v117_v11 }
 0x171   :  { %v119_v14 = vpop.xlane.xlu0 %118 }
 0x172   :  { %v128_v15 = vadd.f32 %v141_v13, %v119_v14 }
 0x174   :  { %130 = vst.msk [vmem:[%s260_s5] sm:$0xff] %vm129_vm2, %v128_v15 }
 0x175   :  { %135 = vsyncpa [#allocation4], 1 }
 0x176   :  { %136 = vsyncpa [#allocation6], 1 }

</bundles_post_ra>
